<compile_context>
chip_gen: v6e
topology: v6e:2x2x1
jax: 0.10.0
libtpu: 0.0.40
codegen_flags: <defaults>
</compile_context>

<pallas_src>
import functools

import jax
import jax.numpy as jnp
from jax.experimental import pallas as pl
from jax.experimental.pallas import tpu as pltpu


NUM_CLASSES = 10    # real fc3 output width
CLASS_PAD = 128     # lane-dense padded class dim
HIDDEN_PAD = 128    # 120 -> 128, 84 -> 128


def mnist_kernel(x_ref, w1_ref, b1_ref, w2_ref, b2_ref, w3_ref, b3_ref,
                 o_ref, *, num_classes):
    # fc1 + relu  (bf16 operands, f32 MXU accumulation)
    h = jnp.dot(x_ref[...], w1_ref[...], preferred_element_type=jnp.float32)
    h = jnp.maximum(h + b1_ref[...], 0.0)
    # fc2 + relu
    h = jnp.dot(h.astype(jnp.bfloat16), w2_ref[...],
                preferred_element_type=jnp.float32)
    h = jnp.maximum(h + b2_ref[...], 0.0)
    # fc3 + relu (the reference applies relu before softmax)
    h = jnp.dot(h.astype(jnp.bfloat16), w3_ref[...],
                preferred_element_type=jnp.float32)
    h = jnp.maximum(h + b3_ref[...], 0.0)
    # Mask the padded (>= num_classes) logit lanes so the zero-padded fc3
    # columns do not contribute to the softmax denominator.
    col = jax.lax.broadcasted_iota(jnp.int32, h.shape, dimension=1)
    h = jnp.where(col < num_classes, h, -1e30)
    # softmax over the class (last) axis, in f32
    m = jnp.max(h, axis=-1, keepdims=True)
    e = jnp.exp(h - m)
    denom = jnp.sum(e, axis=-1, keepdims=True)
    o_ref[...] = (e * pl.reciprocal(denom, approx=True)).astype(o_ref.dtype)


def _cdiv(a, b):
    return (a + b - 1) // b


def _round_up(x, m):
    return ((x + m - 1) // m) * m


def _choose_batch_tile(B, tile_b):
    """Pick the batch tile (multiple of 16 = bf16 sublane packing)."""
    if B >= 2 * tile_b:
        return tile_b
    if B >= 64:
        # Split into at least two tiles so the "parallel" batch axis shards
        # across the two TensorCores on v7x (harmless on v5e/v6e).
        return _round_up(_cdiv(B, 2), 16)
    return _round_up(B, 16)


def init_params(key):
    # Classic MNIST MLP: fc1 784->120, fc2 120->84, fc3 84->10.
    k1, k2, k3, k4, k5, k6 = jax.random.split(key, 6)
    # Stored already transposed: (in, out), matching ttnn.transpose(w, -2, -1).
    w1 = jax.random.normal(k1, (784, 120), jnp.float32) * 0.05
    b1 = jax.random.normal(k2, (1, 120), jnp.float32) * 0.05
    w2 = jax.random.normal(k3, (120, 84), jnp.float32) * 0.05
    b2 = jax.random.normal(k4, (1, 84), jnp.float32) * 0.05
    w3 = jax.random.normal(k5, (84, 10), jnp.float32) * 0.05
    b3 = jax.random.normal(k6, (1, 10), jnp.float32) * 0.05
    return (w1, b1, w2, b2, w3, b3)


def prepare_params(params):
    """One-time weight prep: zero-pad hidden dims and the class dim to 128,
    cast weights to bf16 (biases stay f32)."""
    w1, b1, w2, b2, w3, b3 = params
    H1 = H2 = HIDDEN_PAD
    CP = CLASS_PAD
    w1p = jnp.zeros((w1.shape[0], H1), jnp.float32).at[:, : w1.shape[1]].set(w1)
    b1p = jnp.zeros((1, H1), jnp.float32).at[:, : b1.shape[1]].set(b1)
    w2p = jnp.zeros((H1, H2), jnp.float32).at[: w2.shape[0], : w2.shape[1]].set(w2)
    b2p = jnp.zeros((1, H2), jnp.float32).at[:, : b2.shape[1]].set(b2)
    w3p = jnp.zeros((H2, CP), jnp.float32).at[: w3.shape[0], : w3.shape[1]].set(w3)
    b3p = jnp.zeros((1, CP), jnp.float32).at[:, : b3.shape[1]].set(b3)
    return (w1p.astype(jnp.bfloat16), b1p,
            w2p.astype(jnp.bfloat16), b2p,
            w3p.astype(jnp.bfloat16), b3p)


def mnist_forward(x_nchw, prepped, tile_b=1024):
    """x_nchw: (B, 1, 28, 28) float32 -> (B, 10) float32 softmax probs."""
    w1, b1, w2, b2, w3, b3 = prepped
    B = x_nchw.shape[0]
    K, H1 = w1.shape
    H2 = w2.shape[1]
    CP = w3.shape[1]

    # Flatten (matches torch reshape to (B,1,1,784)) and cast to bf16.
    # The 784-wide K dim is deliberately NOT padded (input-BW-bound kernel).
    x2d = x_nchw.reshape(B, K).astype(jnp.bfloat16)

    tb = _choose_batch_tile(B, tile_b)
    b_pad = _round_up(B, tb)
    if b_pad != B:
        x2d = jnp.pad(x2d, ((0, b_pad - B), (0, 0)))
    grid = (b_pad // tb,)

    flops = 2 * b_pad * (K * H1 + H1 * H2 + H2 * CP)
    transcendentals = b_pad * (CP + 1)
    bytes_accessed = (x2d.size * 2
                      + (w1.size + w2.size + w3.size) * 2
                      + (b1.size + b2.size + b3.size) * 4
                      + b_pad * CP * 4)
    cost = pl.CostEstimate(flops=flops, transcendentals=transcendentals,
                           bytes_accessed=bytes_accessed)

    # Weights/biases: same block (0, ...) every grid step -> resident in VMEM.
    # Single-buffered: a second pipeline buffer would never be used.
    def resident(arr):
        nd = arr.ndim
        return pl.BlockSpec(arr.shape, lambda i: (0,) * nd,
                            pipeline_mode=pl.Buffered(1))

    # Rough VMEM footprint: double-buffered x/out tiles + resident params +
    # f32 intermediates. Only raise the scoped-VMEM limit when actually
    # needed (v5e default is 16 MiB scoped VMEM).
    vmem_est = (2 * tb * K * 2 + 2 * tb * CP * 4
                + (w1.size + w2.size + w3.size) * 2
                + (b1.size + b2.size + b3.size) * 4
                + 3 * tb * HIDDEN_PAD * 4)
    cp_kwargs = dict(dimension_semantics=("parallel",))
    if vmem_est > 12 * (1 << 20):
        cp_kwargs["vmem_limit_bytes"] = int(min(2 * vmem_est, 64 * (1 << 20)))

    kernel = functools.partial(mnist_kernel, num_classes=NUM_CLASSES)

    out = pl.pallas_call(
        kernel,
        out_shape=jax.ShapeDtypeStruct((b_pad, CP), jnp.float32),
        grid=grid,
        in_specs=[
            pl.BlockSpec((tb, K), lambda i: (i, 0)),
            resident(w1), resident(b1),
            resident(w2), resident(b2),
            resident(w3), resident(b3),
        ],
        out_specs=pl.BlockSpec((tb, CP), lambda i: (i, 0)),
        compiler_params=pltpu.CompilerParams(**cp_kwargs),
        cost_estimate=cost,
    )(x2d, w1, b1, w2, b2, w3, b3)
    return out[:B, :NUM_CLASSES]


def reference_forward_bf16(x_nchw, prepped):
    """Pure-JAX reference using the same bf16/padded params as the kernel."""
    w1, b1, w2, b2, w3, b3 = prepped
    B = x_nchw.shape[0]
    h = x_nchw.reshape(B, 784).astype(jnp.bfloat16)
    h = jnp.maximum(jnp.dot(h, w1, preferred_element_type=jnp.float32) + b1, 0.0)
    h = jnp.maximum(jnp.dot(h.astype(jnp.bfloat16), w2,
                            preferred_element_type=jnp.float32) + b2, 0.0)
    h = jnp.maximum(jnp.dot(h.astype(jnp.bfloat16), w3,
                            preferred_element_type=jnp.float32) + b3, 0.0)
    return jax.nn.softmax(h[:, :NUM_CLASSES], axis=-1)


def reference_forward_f32(x_nchw, params):
    """Full-precision reference from the original (unpadded, f32) params."""
    w1, b1, w2, b2, w3, b3 = params
    B = x_nchw.shape[0]
    h = x_nchw.reshape(B, 784)
    h = jnp.maximum(h @ w1 + b1, 0.0)
    h = jnp.maximum(h @ w2 + b2, 0.0)
    h = jnp.maximum(h @ w3 + b3, 0.0)
    return jax.nn.softmax(h, axis=-1)


if __name__ == "__main__":
    key = jax.random.PRNGKey(0)
    kx, kp = jax.random.split(key)
    B = 8
    x = jax.random.normal(kx, (B, 1, 28, 28), jnp.float32)
    params = init_params(kp)
    prepped = prepare_params(params)

    out = mnist_forward(x, prepped)
    out = jax.block_until_ready(out)
    assert out.shape == (B, NUM_CLASSES)

    # Tight check vs a reference that uses the same bf16/padded params.
    ref_bf16 = reference_forward_bf16(x, prepped)
    assert jnp.allclose(out, ref_bf16, atol=2e-3, rtol=2e-3), "mismatch vs bf16 reference"

    # Looser sanity check vs the full-f32 reference (bf16 quantization error).
    ref_f32 = reference_forward_f32(x, params)
    assert jnp.allclose(out, ref_f32, atol=3e-2), "mismatch vs f32 reference"

    # Softmax rows sum to ~1 (approx reciprocal allows a tiny slack).
    assert jnp.allclose(jnp.sum(out, axis=-1), 1.0, atol=5e-3), "softmax not normalized"

    print("KERNEL_OK")
</pallas_src>

<mosaic_0001>
module attributes {stable_mosaic.version = 11 : i64} {
  func.func @mnist_kernel(%arg0: i32, %arg1: memref<16x784xbf16, #tpu.memory_space<vmem>>, %arg2: memref<784x128xbf16, #tpu.memory_space<vmem>>, %arg3: memref<1x128xf32, #tpu.memory_space<vmem>>, %arg4: memref<128x128xbf16, #tpu.memory_space<vmem>>, %arg5: memref<1x128xf32, #tpu.memory_space<vmem>>, %arg6: memref<128x128xbf16, #tpu.memory_space<vmem>>, %arg7: memref<1x128xf32, #tpu.memory_space<vmem>>, %arg8: memref<16x128xf32, #tpu.memory_space<vmem>>) attributes {dimension_semantics = [#tpu.dimension_semantics<parallel>], iteration_bounds = array<i64: 1>, scalar_prefetch = 0 : i64, scratch_operands = 0 : i64, tpu.core_type = #tpu.core_type<tc>, window_params = [{transform_indices = @transform_0, window_bounds = array<i64: 16, 784>}, {pipeline_mode = #tpu.pipeline_mode<synchronous>, transform_indices = @transform_1, window_bounds = array<i64: 784, 128>}, {pipeline_mode = #tpu.pipeline_mode<synchronous>, transform_indices = @transform_2, window_bounds = array<i64: 1, 128>}, {pipeline_mode = #tpu.pipeline_mode<synchronous>, transform_indices = @transform_3, window_bounds = array<i64: 128, 128>}, {pipeline_mode = #tpu.pipeline_mode<synchronous>, transform_indices = @transform_4, window_bounds = array<i64: 1, 128>}, {pipeline_mode = #tpu.pipeline_mode<synchronous>, transform_indices = @transform_5, window_bounds = array<i64: 128, 128>}, {pipeline_mode = #tpu.pipeline_mode<synchronous>, transform_indices = @transform_6, window_bounds = array<i64: 1, 128>}, {transform_indices = @transform_7, window_bounds = array<i64: 16, 128>}]} {
    %c0 = arith.constant 0 : index
    %c0_0 = arith.constant 0 : index
    %0 = vector.load %arg1[%c0, %c0_0] : memref<16x784xbf16, #tpu.memory_space<vmem>>, vector<16x784xbf16>
    %c0_1 = arith.constant 0 : index
    %c0_2 = arith.constant 0 : index
    %1 = vector.load %arg2[%c0_1, %c0_2] : memref<784x128xbf16, #tpu.memory_space<vmem>>, vector<784x128xbf16>
    %cst = arith.constant dense<0.000000e+00> : vector<16x128xf32>
    %2 = tpu.matmul %0, %1, %cst {dimension_numbers = #tpu.dot_dimension_numbers<[1], [0], [0], [1], [0, 0, 1, 1], [], []>} : vector<16x784xbf16>, vector<784x128xbf16>, vector<16x128xf32> -> vector<16x128xf32>
    %c0_3 = arith.constant 0 : index
    %c0_4 = arith.constant 0 : index
    %3 = vector.load %arg3[%c0_3, %c0_4] : memref<1x128xf32, #tpu.memory_space<vmem>>, vector<1x128xf32>
    %4 = vector.broadcast %3 : vector<1x128xf32> to vector<16x128xf32>
    %5 = arith.addf %2, %4 : vector<16x128xf32>
    %cst_5 = arith.constant 0.000000e+00 : f32
    %6 = vector.broadcast %cst_5 : f32 to vector<16x128xf32>
    %7 = arith.maximumf %5, %6 : vector<16x128xf32>
    %8 = arith.truncf %7 : vector<16x128xf32> to vector<16x128xbf16>
    %c0_6 = arith.constant 0 : index
    %c0_7 = arith.constant 0 : index
    %9 = vector.load %arg4[%c0_6, %c0_7] : memref<128x128xbf16, #tpu.memory_space<vmem>>, vector<128x128xbf16>
    %cst_8 = arith.constant dense<0.000000e+00> : vector<16x128xf32>
    %10 = tpu.matmul %8, %9, %cst_8 {dimension_numbers = #tpu.dot_dimension_numbers<[1], [0], [0], [1], [0, 0, 1, 1], [], []>} : vector<16x128xbf16>, vector<128x128xbf16>, vector<16x128xf32> -> vector<16x128xf32>
    %c0_9 = arith.constant 0 : index
    %c0_10 = arith.constant 0 : index
    %11 = vector.load %arg5[%c0_9, %c0_10] : memref<1x128xf32, #tpu.memory_space<vmem>>, vector<1x128xf32>
    %12 = vector.broadcast %11 : vector<1x128xf32> to vector<16x128xf32>
    %13 = arith.addf %10, %12 : vector<16x128xf32>
    %cst_11 = arith.constant 0.000000e+00 : f32
    %14 = vector.broadcast %cst_11 : f32 to vector<16x128xf32>
    %15 = arith.maximumf %13, %14 : vector<16x128xf32>
    %16 = arith.truncf %15 : vector<16x128xf32> to vector<16x128xbf16>
    %c0_12 = arith.constant 0 : index
    %c0_13 = arith.constant 0 : index
    %17 = vector.load %arg6[%c0_12, %c0_13] : memref<128x128xbf16, #tpu.memory_space<vmem>>, vector<128x128xbf16>
    %cst_14 = arith.constant dense<0.000000e+00> : vector<16x128xf32>
    %18 = tpu.matmul %16, %17, %cst_14 {dimension_numbers = #tpu.dot_dimension_numbers<[1], [0], [0], [1], [0, 0, 1, 1], [], []>} : vector<16x128xbf16>, vector<128x128xbf16>, vector<16x128xf32> -> vector<16x128xf32>
    %c0_15 = arith.constant 0 : index
    %c0_16 = arith.constant 0 : index
    %19 = vector.load %arg7[%c0_15, %c0_16] : memref<1x128xf32, #tpu.memory_space<vmem>>, vector<1x128xf32>
    %20 = vector.broadcast %19 : vector<1x128xf32> to vector<16x128xf32>
    %21 = arith.addf %18, %20 : vector<16x128xf32>
    %cst_17 = arith.constant 0.000000e+00 : f32
    %22 = vector.broadcast %cst_17 : f32 to vector<16x128xf32>
    %23 = arith.maximumf %21, %22 : vector<16x128xf32>
    %24 = tpu.iota {dimensions = array<i32: 1>} : vector<16x128xi32>
    %c10_i32 = arith.constant 10 : i32
    %25 = vector.broadcast %c10_i32 : i32 to vector<16x128xi32>
    %26 = arith.cmpi slt, %24, %25 : vector<16x128xi32>
    %cst_18 = arith.constant -1.000000e+30 : f32
    %27 = vector.broadcast %cst_18 : f32 to vector<16x128xf32>
    %28 = arith.select %26, %23, %27 : vector<16x128xi1>, vector<16x128xf32>
    %cst_19 = arith.constant dense<0xFF800000> : vector<16xf32>
    %29 = vector.multi_reduction <maximumf>, %28, %cst_19 [1] : vector<16x128xf32> to vector<16xf32>
    %30 = vector.shape_cast %29 : vector<16xf32> to vector<16x1xf32>
    %31 = vector.broadcast %30 : vector<16x1xf32> to vector<16x128xf32>
    %32 = arith.subf %28, %31 : vector<16x128xf32>
    %33 = math.exp %32 : vector<16x128xf32>
    %cst_20 = arith.constant dense<0.000000e+00> : vector<16xf32>
    %34 = vector.multi_reduction <add>, %33, %cst_20 [1] : vector<16x128xf32> to vector<16xf32>
    %35 = vector.shape_cast %34 : vector<16xf32> to vector<16x1xf32>
    %36 = tpu.reciprocal %35 {approx = true} : vector<16x1xf32> -> vector<16x1xf32>
    %37 = vector.broadcast %36 : vector<16x1xf32> to vector<16x128xf32>
    %38 = arith.mulf %33, %37 : vector<16x128xf32>
    %c0_21 = arith.constant 0 : index
    %c0_22 = arith.constant 0 : index
    %39 = vector.load %arg8[%c0_21, %c0_22] : memref<16x128xf32, #tpu.memory_space<vmem>>, vector<16x128xf32>
    tpu.vector_store %arg8[%c0_21, %c0_22], %38 {strides = array<i32>} : memref<16x128xf32, #tpu.memory_space<vmem>>, vector<16x128xf32>,
    return
  }
  func.func @transform_0(%arg0: i32) -> (i32, i32) {
    %c0_i32 = arith.constant 0 : i32
    %c0_i32_0 = arith.constant 0 : i32
    return %arg0, %c0_i32 : i32, i32
  }
  func.func @transform_1(%arg0: i32) -> (i32, i32) {
    %c0_i32 = arith.constant 0 : i32
    %c0_i32_0 = arith.constant 0 : i32
    %c0_i32_1 = arith.constant 0 : i32
    return %c0_i32, %c0_i32_0 : i32, i32
  }
  func.func @transform_2(%arg0: i32) -> (i32, i32) {
    %c0_i32 = arith.constant 0 : i32
    %c0_i32_0 = arith.constant 0 : i32
    %c0_i32_1 = arith.constant 0 : i32
    return %c0_i32, %c0_i32_0 : i32, i32
  }
  func.func @transform_3(%arg0: i32) -> (i32, i32) {
    %c0_i32 = arith.constant 0 : i32
    %c0_i32_0 = arith.constant 0 : i32
    %c0_i32_1 = arith.constant 0 : i32
    return %c0_i32, %c0_i32_0 : i32, i32
  }
  func.func @transform_4(%arg0: i32) -> (i32, i32) {
    %c0_i32 = arith.constant 0 : i32
    %c0_i32_0 = arith.constant 0 : i32
    %c0_i32_1 = arith.constant 0 : i32
    return %c0_i32, %c0_i32_0 : i32, i32
  }
  func.func @transform_5(%arg0: i32) -> (i32, i32) {
    %c0_i32 = arith.constant 0 : i32
    %c0_i32_0 = arith.constant 0 : i32
    %c0_i32_1 = arith.constant 0 : i32
    return %c0_i32, %c0_i32_0 : i32, i32
  }
  func.func @transform_6(%arg0: i32) -> (i32, i32) {
    %c0_i32 = arith.constant 0 : i32
    %c0_i32_0 = arith.constant 0 : i32
    %c0_i32_1 = arith.constant 0 : i32
    return %c0_i32, %c0_i32_0 : i32, i32
  }
  func.func @transform_7(%arg0: i32) -> (i32, i32) {
    %c0_i32 = arith.constant 0 : i32
    %c0_i32_0 = arith.constant 0 : i32
    return %arg0, %c0_i32 : i32, i32
  }
}

</mosaic_0001>

<bundles_post_ra>
// kernel: tpu_custom_call.1
= control target key start
LH: loop header
LB: loop body
LE: loop exit
PB: predicated region body
PF: predicated region fallthrough
CT: control target
= control target key end

     0   :  { %12 = vsyncpa [#allocation3], 0  ;;  %s1490_s0 = inlined_call_operand.hbm [shape: bf16[16,784], index: 0, kind: input, shape index: {}]   ;;  %s1491_s1 = inlined_call_operand.hbm [shape: bf16[784,128], index: 1, kind: input, shape index: {}]   ;;  %s1492_s2 = inlined_call_operand.vmem [shape: f32[1,128], index: 2, kind: input, shape index: {}]   ;;  %s1493_s3 = inlined_call_operand.hbm [shape: bf16[128,128], index: 3, kind: input, shape index: {}]   ;;  %s1494_s4 = inlined_call_operand.vmem [shape: f32[1,128], index: 4, kind: input, shape index: {}]   ;;  %s1495_s5 = inlined_call_operand.hbm [shape: bf16[128,128], index: 5, kind: input, shape index: {}]   ;;  %s1496_s6 = inlined_call_operand.vmem [shape: f32[1,128], index: 6, kind: input, shape index: {}]   ;;  %s1497_s7 = inlined_call_operand.hbm [shape: f32[16,128], index: 7, kind: output, shape index: {}]  }
   0x1   :  { %13 = vsyncpa [#allocation6], 0 }
   0x2   :  { %14 = vsyncpa [#allocation9], 0 }
   0x3   :  { %15 = vsyncpa [#allocation4], 0  ;;  %s1381_s24 = smov [#allocation5]  }
   0x4   :  { %s33_s25 = sshll.u32 %s1381_s24, 4  ;;  %s34_s25 = int_to_ptr.vmem [resolvable:$true] %s33_s25 }
   0x5   :  { %s1281_s26 = scalar_lea.vmem %s34_s25, 6272  ;;  %p1286_p1 = scmp.lt.s32.totalorder %s34_s25, %s34_s25 }
   0x6   :  { %p1282_p0 = scmp.ne.s32.totalorder %s34_s25, %s1281_s26  ;;  %p1287_p2 = scmp.lt.s32.totalorder %s1281_s26, %s1281_s26 }
   0x8   :  { %p1288_p3 = por %p1287_p2, %p1286_p1 }
   0xa   :  { %p1289_p4 = pnand %p1288_p3, %p1282_p0 }
   0xc   :  { %1292 = shalt.err (!%p1289_p4)
}
   0xd   :  { %s1382_s27 = smov 64   ;;  %s1383_s28 = smov 4  }
   0xe   :  { %39 = dma.hbm_to_vmem [thread:$0]  %s1491_s1, 6272, %s34_s25, [#allocation6], %s1382_s27, %s1382_s27, %s1383_s28  }
   0xf   :  { %s1384_s8 = smov [#allocation2]  }
  0x10   :  { %s21_s9 = sshll.u32 %s1384_s8, 4  ;;  %s22_s9 = int_to_ptr.vmem [resolvable:$true] %s21_s9 }
  0x11   :  { %s1301_s10 = scalar_lea.vmem %s22_s9, 896  ;;  %p1306_p6 = scmp.lt.s32.totalorder %s22_s9, %s22_s9 }
  0x12   :  { %p1302_p5 = scmp.ne.s32.totalorder %s22_s9, %s1301_s10  ;;  %p1307_p7 = scmp.lt.s32.totalorder %s1301_s10, %s1301_s10 }
  0x14   :  { %p1308_p8 = por %p1307_p7, %p1306_p6 }
  0x16   :  { %p1309_p9 = pnand %p1308_p8, %p1302_p5 }
  0x18   :  { %1312 = shalt.err (!%p1309_p9)
}
  0x19   :  { %s1385_s11 = smov 448   ;;  %s1386_s12 = smov 28  }
  0x1a   :  { %27 = dma.hbm_to_vmem [thread:$0]  %s1490_s0, 896, %s22_s9, [#allocation3], %s1385_s11, %s1385_s11, %s1386_s12  }
  0x1b   :  { %s1387_s15 = smov [#allocation7]   ;;  %s1388_s17 = smov [#allocation8]  }
  0x1c   :  { %s47_s16 = sshll.u32 %s1387_s15, 4  ;;  %s61_s1 = sshll.u32 %s1388_s17, 4  ;;  %s48_s16 = int_to_ptr.vmem [resolvable:$true] %s47_s16  ;;  %s62_s1 = int_to_ptr.vmem [resolvable:$true] %s61_s1 }
  0x1d   :  { %s1321_s18 = scalar_lea.vmem %s48_s16, 1024  ;;  %p1326_p11 = scmp.lt.s32.totalorder %s48_s16, %s48_s16 }
  0x1e   :  { %p1322_p10 = scmp.ne.s32.totalorder %s48_s16, %s1321_s18  ;;  %p1327_p12 = scmp.lt.s32.totalorder %s1321_s18, %s1321_s18 }
  0x20   :  { %p1328_p13 = por %p1327_p12, %p1326_p11 }
  0x22   :  { %p1329_p0 = pnand %p1328_p13, %p1322_p10 }
  0x24   :  { %1332 = shalt.err (!%p1329_p0)
}
  0x25   :  { %53 = dma.hbm_to_vmem [thread:$0]  %s1493_s3, 1024, %s48_s16, [#allocation6], %s1382_s27, %s1382_s27, %s1383_s28  }
  0x26   :  { %s1341_s0 = scalar_lea.vmem %s62_s1, 1024  ;;  %p1346_p2 = scmp.lt.s32.totalorder %s62_s1, %s62_s1 }
  0x27   :  { %p1342_p1 = scmp.ne.s32.totalorder %s62_s1, %s1341_s0  ;;  %p1347_p3 = scmp.lt.s32.totalorder %s1341_s0, %s1341_s0 }
  0x29   :  { %p1348_p4 = por %p1347_p3, %p1346_p2 }
  0x2b   :  { %p1349_p5 = pnand %p1348_p4, %p1342_p1 }
  0x2d   :  { %1352 = shalt.err (!%p1349_p5)
}
  0x2e   :  { %67 = dma.hbm_to_vmem [thread:$0]  %s1495_s5, 1024, %s62_s1, [#allocation9], %s1382_s27, %s1382_s27, %s1383_s28  }
  0x2f   :  { %1373 = dma.done.wait [#allocation3], 896  }
  0x30   :  { %1374 = vsyncadd [#allocation3], 4294966400 }
  0x31   :  { %1375 = dma.done.wait [#allocation6], 7296  }
  0x32   :  { %1376 = vsyncadd [#allocation6], 4294960000 }
  0x33   :  { %1377 = dma.done.wait [#allocation9], 1024  }
  0x34   :  { %1378 = vsyncadd [#allocation9], 4294966272  ;;  %v1190_v0 = vld [vmem:[#allocation5 + $0x78] sm:$0xff]   ;;  %v1194_v4 = vld [vmem:[#allocation5 + $0x70] sm:$0xff]   ;;  %v1389_v38 = vmov 0.0   ;;  %vm1390_vm0 = vmmov 0  }
  0x35   :  { %v1191_v1 = vld [vmem:[#allocation5 + $0x38] sm:$0xff]   ;;  %1045 = vmatprep.subr.bf16.mxu0 %v1190_v0  ;;  %v1195_v5 = vld [vmem:[#allocation5 + $0x30] sm:$0xff]   ;;  %v1198_v8 = vld [vmem:[#allocation5 + $0x68] sm:$0xff]   ;;  %vm525_vm1 = vcmask 130048  }
  0x36   :  { %v1192_v2 = vld [vmem:[#allocation5 + $0xf8] sm:$0xff]   ;;  %1046 = vmatpush3.bf16.msra.mxu0 %v1191_v1  ;;  %v1196_v6 = vld [vmem:[#allocation5 + $0xf0] sm:$0xff]   ;;  %v1199_v9 = vld [vmem:[#allocation5 + $0x28] sm:$0xff]  }
  0x37   :  { %v1193_v3 = vld [vmem:[#allocation5 + $0xb8] sm:$0xff]   ;;  %1067 = vmatprep.subr.bf16.mxu1 %v1192_v2  ;;  %1047 = vmatprep.subr.bf16.mxu0 %v1194_v4  ;;  %v1197_v7 = vld [vmem:[#allocation5 + $0xb0] sm:$0xff]   ;;  %v1200_v10 = vld [vmem:[#allocation5 + $0xe8] sm:$0xff]  }
  0x38   :  { %1068 = vmatpush3.bf16.msra.mxu1 %v1193_v3  ;;  %v1201_v11 = vld [vmem:[#allocation5 + $0xa8] sm:$0xff]   ;;  %v1202_v12 = vld [vmem:[#allocation5 + $0x60] sm:$0xff]   ;;  %v1206_v16 = vld [vmem:[#allocation5 + $0x58] sm:$0xff]  }
  0x39   :  { %1069 = vmatprep.subr.bf16.mxu1 %v1196_v6  ;;  %v1203_v13 = vld [vmem:[#allocation5 + $0x20] sm:$0xff]   ;;  %v1207_v17 = vld [vmem:[#allocation5 + $0x18] sm:$0xff]   ;;  %v1210_v20 = vld [vmem:[#allocation5 + $0x50] sm:$0xff]  }
  0x3a   :  { %1048 = vmatpush3.bf16.msra.mxu0 %v1195_v5  ;;  %v1204_v14 = vld [vmem:[#allocation5 + $0xe0] sm:$0xff]   ;;  %v1208_v18 = vld [vmem:[#allocation5 + $0xd8] sm:$0xff]   ;;  %v1211_v21 = vld [vmem:[#allocation5 + $0x10] sm:$0xff]  }
  0x3b   :  { %1049 = vmatprep.subr.bf16.mxu0 %v1198_v8  ;;  %v1205_v15 = vld [vmem:[#allocation5 + $0xa0] sm:$0xff]   ;;  %v1209_v19 = vld [vmem:[#allocation5 + $0x98] sm:$0xff]   ;;  %v1212_v22 = vld [vmem:[#allocation5 + $0xd0] sm:$0xff]  }
  0x3c   :  { %1070 = vmatpush3.bf16.msra.mxu1 %v1197_v7  ;;  %v1213_v23 = vld [vmem:[#allocation5 + $0x90] sm:$0xff]   ;;  %v1214_v24 = vld [vmem:[#allocation5 + $0x48] sm:$0xff]   ;;  %v1218_v28 = vld [vmem:[#allocation5 + $0x40] sm:$0xff]  }
  0x3d   :  { %1071 = vmatprep.subr.bf16.mxu1 %v1200_v10  ;;  %v1215_v25 = vld [vmem:[#allocation5 + $0x8] sm:$0xff]   ;;  %v1219_v29 = vld [vmem:[#allocation5] sm:$0xff]   ;;  %v1225_v34 = vld [vmem:[#allocation5 + $0x178] sm:$0xff]  }
  0x3e   :  { %1050 = vmatpush3.bf16.msra.mxu0 %v1199_v9  ;;  %v1216_v26 = vld [vmem:[#allocation5 + $0xc8] sm:$0xff]   ;;  %v1220_v30 = vld [vmem:[#allocation5 + $0xc0] sm:$0xff]   ;;  %v1228_v36 = vld [vmem:[#allocation2 + $0xc] ss:$28 sps:$4 sm:$0xff]  }
  0x3f   :  { %1051 = vmatprep.subr.bf16.mxu0 %v1202_v12  ;;  %v1217_v27 = vld [vmem:[#allocation5 + $0x88] sm:$0xff]   ;;  %v1224_v33 = vld [vmem:[#allocation5 + $0x80] sm:$0xff]   ;;  %v1229_v37 = vld [vmem:[#allocation5 + $0x138] sm:$0xff]   ;;  %602 = vmatprep.mubr.bf16.mxu1 %v1228_v36 }
  0x40   :  { %1072 = vmatpush3.bf16.msra.mxu1 %v1201_v11  ;;  %v1221_v31 = vld [vmem:[#allocation2] ss:$28 sps:$4 sm:$0xff]   ;;  %v1226_v35 = vld [vmem:[#allocation2 + $0x8] ss:$28 sps:$4 sm:$0xff]   ;;  %v1236_v45 = vld [vmem:[#allocation5 + $0x158] sm:$0xff]  }
  0x41   :  { %1073 = vmatprep.subr.bf16.mxu1 %v1204_v14  ;;  %v1223_v32 = vld [vmem:[#allocation2 + $0x4] ss:$28 sps:$4 sm:$0xff]   ;;  %v1230_v39 = vld [vmem:[#allocation5 + $0x170] sm:$0xff]   ;;  %v1234_v43 = vld [vmem:[#allocation5 + $0x160] sm:$0xff]  }
  0x42   :  { %1052 = vmatpush3.bf16.msra.mxu0 %v1203_v13  ;;  %561 = vmatprep.mubr.bf16.mxu0 %v1223_v32  ;;  %v1231_v40 = vld [vmem:[#allocation5 + $0x130] sm:$0xff]   ;;  %v1232_v41 = vld [vmem:[#allocation5 + $0x168] sm:$0xff]   ;;  %v1235_v44 = vld [vmem:[#allocation5 + $0x120] sm:$0xff]  }
  0x43   :  { %1053 = vmatprep.subr.bf16.mxu0 %v1206_v16  ;;  %v1233_v42 = vld [vmem:[#allocation5 + $0x128] sm:$0xff]   ;;  %v1237_v46 = vld [vmem:[#allocation5 + $0x118] sm:$0xff]   ;;  %v1238_v47 = vld [vmem:[#allocation5 + $0x150] sm:$0xff]  }
  0x44   :  { %1074 = vmatpush3.bf16.msra.mxu1 %v1205_v15  ;;  %v1244_v48 = vld [vmem:[#allocation5 + $0x180] sm:$0xff]   ;;  %v1239_v49 = vld [vmem:[#allocation5 + $0x110] sm:$0xff]   ;;  %v1247_v50 = vld [vmem:[#allocation2 + $0x14] ss:$28 sps:$4 sm:$0xff]  }
  0x45   :  { %1075 = vmatprep.subr.bf16.mxu1 %v1208_v18  ;;  %v1240_v51 = vld [vmem:[#allocation5 + $0x148] sm:$0xff]   ;;  %v1248_v52 = vld [vmem:[#allocation2 + $0x18] ss:$28 sps:$4 sm:$0xff]   ;;  %v1245_v56 = vld [vmem:[#allocation2 + $0x10] ss:$28 sps:$4 sm:$0xff]  }
  0x46   :  { %1054 = vmatpush3.bf16.msra.mxu0 %v1207_v17  ;;  %v1241_v53 = vld [vmem:[#allocation5 + $0x108] sm:$0xff]   ;;  %v1242_v54 = vld [vmem:[#allocation5 + $0x140] sm:$0xff]   ;;  %v1250_v58 = vld [vmem:[#allocation7 + $0x30] sm:$0xff]  }
  0x47   :  { %1055 = vmatprep.subr.bf16.mxu0 %v1210_v20  ;;  %v1243_v55 = vld [vmem:[#allocation5 + $0x100] sm:$0xff]   ;;  %v1251_v59 = vld [vmem:[#allocation7 + $0x28] sm:$0xff]   ;;  %v1252_v60 = vld [vmem:[#allocation7 + $0x20] sm:$0xff]  }
  0x48   :  { %1076 = vmatpush3.bf16.msra.mxu1 %v1209_v19  ;;  %v1249_v57 = vld [vmem:[#allocation7 + $0x38] sm:$0xff]   ;;  %v1254_v62 = vld [vmem:[#allocation7 + $0x10] sm:$0xff]   ;;  %v1255_v63 = vld [vmem:[#allocation7 + $0x8] sm:$0xff]  }
  0x49   :  { %1077 = vmatprep.subr.bf16.mxu1 %v1212_v22  ;;  %v1253_v61 = vld [vmem:[#allocation7 + $0x18] sm:$0xff]   ;;  %v1256_v0 = vld [vmem:[#allocation7] sm:$0xff]   ;;  %v1258_v2 = vld [vmem:[#allocation8 + $0x30] sm:$0xff]  }
  0x4a   :  { %1056 = vmatpush3.bf16.msra.mxu0 %v1211_v21  ;;  %v1257_v1 = vld [vmem:[#allocation8 + $0x38] sm:$0xff]   ;;  %v1259_v3 = vld [vmem:[#allocation8 + $0x28] sm:$0xff]   ;;  %v1260_v4 = vld [vmem:[#allocation8 + $0x20] sm:$0xff]  }
  0x4b   :  { %1057 = vmatprep.subr.bf16.mxu0 %v1214_v24  ;;  %v1261_v5 = vld [vmem:[#allocation8 + $0x18] sm:$0xff]   ;;  %v969_v18 = vld [vmem:[%s1492_s2] ss:$0 sm:$0xff] }
  0x4c   :  { %1078 = vmatpush3.bf16.msra.mxu1 %v1213_v23 }
  0x4d   :  { %1079 = vmatprep.subr.bf16.mxu1 %v1216_v26 }
  0x4e   :  { %1058 = vmatpush3.bf16.msra.mxu0 %v1215_v25 }
  0x4f   :  { %1059 = vmatprep.subr.bf16.mxu0 %v1218_v28 }
  0x50   :  { %1080 = vmatpush3.bf16.msra.mxu1 %v1217_v27 }
  0x51   :  { %1081 = vmatprep.subr.bf16.mxu1 %v1220_v30 }
  0x52   :  { %1060 = vmatpush3.bf16.msra.mxu0 %v1219_v29 }
  0x53   :  { %1089 = vmatprep.subr.bf16.mxu0 %v1225_v34 }
  0x54   :  { %1082 = vmatpush3.bf16.msra.mxu1 %v1224_v33 }
  0x55   :  { %562 = vmatmul.mubr.bf16.vlgmr.msra.gmra.mxu0 %v1221_v31  ;;  %1131 = vmatprep.subr.bf16.mxu1 %v1389_v38 }
  0x56   :  { %1090 = vmatpush3.bf16.msra.mxu0 %v1229_v37  ;;  %643 = vmatprep.mubr.bf16.mxu0 %v1247_v50 }
  0x57   :  { %603 = vmatmul.mubr.bf16.vlgmr.msra.gmra.mxu1 %v1226_v35  ;;  %1091 = vmatprep.subr.bf16.mxu0 %v1230_v39 }
  0x58   :  { %1133 = vmatprep.mubr.msk.bf16.mxu1 %vm1390_vm0, %v1389_v38  ;;  %1132 = vmatpush3.bf16.msra.mxu1 %v1244_v48 }
  0x59   :  { %1137 = vmatprep.subr.bf16.mxu1 %v1389_v38 }
  0x5a   :  { %1092 = vmatpush3.bf16.msra.mxu0 %v1231_v40 }
  0x5b   :  { %1093 = vmatprep.subr.bf16.mxu0 %v1232_v41  ;;  %v1262_v41 = vld [vmem:[#allocation8 + $0x10] sm:$0xff]  }
  0x5e   :  { %1094 = vmatpush3.bf16.msra.mxu0 %v1233_v42  ;;  %v1263_v42 = vld [vmem:[#allocation8 + $0x8] sm:$0xff]  }
  0x5f   :  { %1095 = vmatprep.subr.bf16.mxu0 %v1234_v43  ;;  %1134 = vmatmul.mubr.msk.bf16.vlgmr.msra.gmra.mxu1 %vm525_vm1, %v1248_v52  ;;  %v1264_v43 = vld [vmem:[#allocation8] sm:$0xff]  }
  0x60   :  { %1153 = vmatprep.mubr.msk.bf16.mxu1 %vm1390_vm0, %v1389_v38  ;;  %1138 = vmatpush3.bf16.msra.mxu1 %v1249_v57 }
  0x61   :  { %1139 = vmatprep.subr.bf16.mxu1 %v1389_v38 }
  0x62   :  { %1096 = vmatpush3.bf16.msra.mxu0 %v1235_v44  ;;  %v1027_v44 = vld [vmem:[%s1494_s4] ss:$0 sm:$0xff]  ;;  %s1391_s4 = smov [#allocation10]  }
  0x63   :  { %1097 = vmatprep.subr.bf16.mxu0 %v1236_v45 }
  0x64   :  { %1140 = vmatpush3.bf16.msra.mxu1 %v1250_v58 }
  0x65   :  { %1141 = vmatprep.subr.bf16.mxu1 %v1389_v38 }
  0x66   :  { %1098 = vmatpush3.bf16.msra.mxu0 %v1237_v46 }
  0x67   :  { %1099 = vmatprep.subr.bf16.mxu0 %v1238_v47 }
  0x68   :  { %1142 = vmatpush3.bf16.msra.mxu1 %v1251_v59 }
  0x69   :  { %1143 = vmatprep.subr.bf16.mxu1 %v1389_v38 }
  0x6a   :  { %1100 = vmatpush3.bf16.msra.mxu0 %v1239_v49 }
  0x6b   :  { %1101 = vmatprep.subr.bf16.mxu0 %v1240_v51 }
  0x6c   :  { %1144 = vmatpush3.bf16.msra.mxu1 %v1252_v60 }
  0x6d   :  { %1145 = vmatprep.subr.bf16.mxu1 %v1389_v38 }
  0x6e   :  { %1102 = vmatpush3.bf16.msra.mxu0 %v1241_v53 }
  0x6f   :  { %1103 = vmatprep.subr.bf16.mxu0 %v1242_v54  ;;  %v925_v54 = vlaneseq }
  0x70   :  { %1146 = vmatpush3.bf16.msra.mxu1 %v1253_v61 }
  0x71   :  { %1147 = vmatprep.subr.bf16.mxu1 %v1389_v38 }
  0x72   :  { %1104 = vmatpush3.bf16.msra.mxu0 %v1243_v55  ;;  %v926_v55 = vand.u32 127, %v925_v54 }
  0x73   :  { %1157 = vmatprep.subr.bf16.mxu0 %v1389_v38 }
  0x74   :  { %1148 = vmatpush3.bf16.msra.mxu1 %v1254_v62  ;;  %vm927_vm2 = vcmp.lt.s32.totalorder %v926_v55, 10 }
  0x75   :  { %644 = vmatmul.mubr.bf16.vlgmr.msra.gmra.mxu0 %v1245_v56  ;;  %1149 = vmatprep.subr.bf16.mxu1 %v1389_v38 }
  0x76   :  { %1173 = vmatprep.mubr.msk.bf16.mxu0 %vm1390_vm0, %v1389_v38  ;;  %1158 = vmatpush3.bf16.msra.mxu0 %v1257_v1 }
  0x77   :  { %1159 = vmatprep.subr.bf16.mxu0 %v1389_v38 }
  0x78   :  { %1150 = vmatpush3.bf16.msra.mxu1 %v1255_v63 }
  0x79   :  { %1151 = vmatprep.subr.bf16.mxu1 %v1389_v38 }
  0x7a   :  { %1160 = vmatpush3.bf16.msra.mxu0 %v1258_v2 }
  0x7b   :  { %1161 = vmatprep.subr.bf16.mxu0 %v1389_v38 }
  0x7c   :  { %1152 = vmatpush3.bf16.msra.mxu1 %v1256_v0 }
  0x7e   :  { %1162 = vmatpush3.bf16.msra.mxu0 %v1259_v3 }
  0x7f   :  { %1163 = vmatprep.subr.bf16.mxu0 %v1389_v38 }
  0x82   :  { %1164 = vmatpush3.bf16.msra.mxu0 %v1260_v4 }
  0x83   :  { %1165 = vmatprep.subr.bf16.mxu0 %v1389_v38 }
  0x86   :  { %1166 = vmatpush3.bf16.msra.mxu0 %v1261_v5 }
  0x87   :  { %1167 = vmatprep.subr.bf16.mxu0 %v1389_v38 }
  0x8a   :  { %1168 = vmatpush3.bf16.msra.mxu0 %v1262_v41 }
  0x8b   :  { %1169 = vmatprep.subr.bf16.mxu0 %v1389_v38 }
  0x8e   :  { %1170 = vmatpush3.bf16.msra.mxu0 %v1263_v42 }
  0x8f   :  { %1171 = vmatprep.subr.bf16.mxu0 %v1389_v38  ;;  %v1036_v38 = vld [vmem:[%s1496_s6] ss:$0 sm:$0xff]  ;;  %s955_s6 = sshll.u32 %s1391_s4, 4  ;;  %s956_s6 = int_to_ptr.vmem [resolvable:$true] %s955_s6 }
  0x90   :  { %s1353_s26 = scalar_lea.vmem %s956_s6, 256  ;;  %p1358_p7 = scmp.lt.s32.totalorder %s956_s6, %s956_s6 }
  0x91   :  { %p1354_p6 = scmp.ne.s32.totalorder %s956_s6, %s1353_s26  ;;  %p1359_p8 = scmp.lt.s32.totalorder %s1353_s26, %s1353_s26 }
  0x92   :  { %1172 = vmatpush3.bf16.msra.mxu0 %v1264_v43 }
  0x93   :  { %p1360_p9 = por %p1359_p8, %p1358_p7 }
  0x95   :  { %p1361_p10 = pnand %p1360_p9, %p1354_p6 }
 0x115   :  { %v1061_v9 = vpop.f32.mrf.mxu0 }
 0x117   :  { %v1083_v6 = vpop.f32.mrf.mxu1  ;;  %v1062_v12 = vpop.f32.mrf.mxu0 }
 0x118   :  { %v1063_v17 = vadd.f32 %v1062_v12, %v1061_v9 }
 0x119   :  { %v1084_v7 = vpop.f32.mrf.mxu1  ;;  %v1064_v15 = vpop.f32.mrf.mxu0 }
 0x11a   :  { %v564_v20 = vadd.f32 %v1063_v17, %v969_v18  ;;  %v1085_v21 = vadd.f32 %v1084_v7, %v1083_v6 }
 0x11b   :  { %v1086_v8 = vpop.f32.mrf.mxu1  ;;  %v1065_v19 = vpop.f32.mrf.mxu0 }
 0x11c   :  { %v1066_v22 = vadd.f32 %v1065_v19, %v1064_v15  ;;  %v605_v25 = vadd.f32 %v1085_v21, %v564_v20 }
 0x11d   :  { %v1087_v10 = vpop.f32.mrf.mxu1 }
 0x11e   :  { %v567_v26 = vadd.f32 %v1066_v22, %v969_v18  ;;  %v1088_v27 = vadd.f32 %v1087_v10, %v1086_v8 }
 0x11f   :  { %v686_v11 = vpop.f32.mrf.mxu1 }
 0x120   :  { %v608_v32 = vadd.f32 %v1088_v27, %v567_v26 }
 0x121   :  { %v1135_v13 = vpop.f32.mrf.mxu1 }
 0x123   :  { %v689_v14 = vpop.f32.mrf.mxu1 }
 0x125   :  { %v1136_v16 = vpop.f32.mrf.mxu1 }
 0x135   :  { %v1105_v23 = vpop.f32.mrf.mxu0 }
 0x137   :  { %v1106_v24 = vpop.f32.mrf.mxu0 }
 0x138   :  { %v1107_v28 = vadd.f32 %v1106_v24, %v1105_v23 }
 0x139   :  { %v1108_v29 = vpop.f32.mrf.mxu0 }
 0x13a   :  { %v646_v30 = vadd.f32 %v1107_v28, %v605_v25 }
 0x13b   :  { %v1109_v31 = vpop.f32.mrf.mxu0 }
 0x13c   :  { %v1110_v33 = vadd.f32 %v1109_v31, %v1108_v29  ;;  %v687_v34 = vadd.f32 %v686_v11, %v646_v30 }
 0x13e   :  { %v649_v35 = vadd.f32 %v1110_v33, %v608_v32  ;;  %v693_v37 = vmax.f32 %v687_v34, 0.0 }
 0x140   :  { %v690_v36 = vadd.f32 %v689_v14, %v649_v35 }
 0x142   :  { %v694_v39 = vmax.f32 %v690_v36, 0.0 }
 0x144   :  { %v695_v40 = vpack.c.bf16 %v694_v39, %v693_v37 }
 0x146   :  { %1154 = vmatmul.mubr.bf16.vlgmr.msra.gmra.mxu1 %v695_v40 }
 0x206   :  { %v801_v45 = vpop.f32.mrf.mxu1 }
 0x207   :  { %v802_v47 = vadd.f32 %v1027_v44, %v801_v45 }
 0x208   :  { %v1155_v46 = vpop.f32.mrf.mxu1 }
 0x209   :  { %v808_v51 = vmax.f32 %v802_v47, 0.0 }
 0x20a   :  { %v804_v48 = vpop.f32.mrf.mxu1 }
 0x20b   :  { %v805_v49 = vadd.f32 %v1027_v44, %v804_v48 }
 0x20c   :  { %v1156_v50 = vpop.f32.mrf.mxu1 }
 0x20d   :  { %v809_v52 = vmax.f32 %v805_v49, 0.0 }
 0x20f   :  { %v810_v53 = vpack.c.bf16 %v809_v52, %v808_v51 }
 0x211   :  { %1174 = vmatmul.mubr.bf16.vlgmr.msra.gmra.mxu0 %v810_v53 }
 0x2d1   :  { %v916_v56 = vpop.f32.mrf.mxu0 }
 0x2d2   :  { %v917_v57 = vadd.f32 %v1036_v38, %v916_v56 }
 0x2d3   :  { %v1175_v58 = vpop.f32.mrf.mxu0 }
 0x2d4   :  { %v923_v59 = vmax.f32 %v917_v57, 0.0 }
 0x2d5   :  { %v919_v60 = vpop.f32.mrf.mxu0 }
 0x2d6   :  { %v920_v61 = vadd.f32 %v1036_v38, %v919_v60  ;;  %v928_v62 = vsel %vm927_vm2, %v923_v59, -1e+30 }
 0x2d7   :  { %930 = vmax.xlane.f32.xlu0 %v928_v62  ;;  %v1176_v63 = vpop.f32.mrf.mxu0 }
 0x2d8   :  { %v924_v0 = vmax.f32 %v920_v61, 0.0 }
 0x2da   :  { %v929_v1 = vsel %vm927_vm2, %v924_v0, -1e+30 }
 0x2db   :  { %932 = vmax.xlane.f32.xlu0 %v929_v1 }
 0x360   :  { %v931_v2 = vpop.xlane.xlu0 %930 }
 0x361   :  { %v934_v3 = vsub.f32 %v928_v62, %v931_v2 }
 0x363   :  { %v936_v4 = vmul.f32 1.442695, %v934_v3 }
 0x364   :  { %v933_v5 = vpop.xlane.xlu0 %932 }
 0x365   :  { %1265 = vpow2.f32 %v936_v4  ;;  %v935_v6 = vsub.f32 %v929_v1, %v933_v5 }
 0x367   :  { %v938_v7 = vmul.f32 1.442695, %v935_v6 }
 0x369   :  { %1267 = vpow2.f32 %v938_v7 }
 0x372   :  { %v1266_v8 = vpop.eup %1265 }
 0x373   :  { %940 = vadd.xlane.f32.xlu1 %v1266_v8 }
 0x376   :  { %v1268_v9 = vpop.eup %1267 }
 0x377   :  { %942 = vadd.xlane.f32.xlu1 %v1268_v9 }
 0x3fc   :  { %v941_v10 = vpop.xlane.xlu1 %940 }
 0x3fd   :  { %1269 = vrcp.f32 %v941_v10 }
 0x400   :  { %v943_v11 = vpop.xlane.xlu1 %942 }
 0x401   :  { %1271 = vrcp.f32 %v943_v11 }
 0x40a   :  { %v1270_v12 = vpop.eup %1269 }
 0x40b   :  { %v946_v13 = vmul.f32 %v1270_v12, %v1266_v8 }
 0x40d   :  { %948 = vst [vmem:[#allocation10] sm:$0xff] %v946_v13 }
 0x40e   :  { %v1272_v14 = vpop.eup %1271 }
 0x40f   :  { %v947_v15 = vmul.f32 %v1272_v14, %v1268_v9 }
 0x411   :  { %949 = vst [vmem:[#allocation10 + $0x8] sm:$0xff] %v947_v15 }
 0x412   :  { %1364 = shalt.err (!%p1361_p10)
}
 0x413   :  { %s1392_s27 = smov 128   ;;  %s1393_s28 = smov 8  }
 0x414   :  { %961 = dma.vmem_to_hbm [thread:$0]  %s956_s6, 256, %s1497_s7, [#allocation4], %s1392_s27, %s1392_s27, %s1393_s28  }
 0x415   :  { %1379 = dma.done.wait [#allocation4], 256  }
 0x416   :  { %1380 = vsyncadd [#allocation4], 4294967040 }
 0x417   :  { %965 = vsyncpa [#allocation3], 1 }
 0x418   :  { %966 = vsyncpa [#allocation6], 1 }
 0x419   :  { %967 = vsyncpa [#allocation9], 1 }
 0x41a   :  { %968 = vsyncpa [#allocation4], 1 }

</bundles_post_ra>
